<compile_context>
chip_gen: v7x
topology: tpu7x:2x2x1
jax: 0.10.0
libtpu: 0.0.40
codegen_flags: <defaults>
</compile_context>

<pallas_src>
import functools
import math

import jax
import jax.numpy as jnp
import numpy as np
from jax.experimental import pallas as pl
from jax.experimental.pallas import tpu as pltpu

NEG_SLOPE = 0.05      # LeakyReLU(negative_slope=0.05)
MAX_TILE_N = 512      # row tile (review suggests 512-2048; per-layer VMEM is tiny)

# Optional: on v6e/v7x set True to run the hidden-layer matmuls with bf16 operands
# (f32 accumulation). Loosen the self-test tolerance to ~1e-2 if enabled.
USE_BF16_MATMUL = False


def _round_up(x, m):
    return ((x + m - 1) // m) * m


def _choose_tile(n):
    if n <= MAX_TILE_N:
        return max(8, _round_up(n, 8))
    return MAX_TILE_N


def _make_pallas_mlp(n_pad, tile_n, p, layer_dims, dtype):
    """Build the gridded pallas_call for one MLP shape signature.

    layer_dims: tuple of (in_dim, out_dim) per Linear layer.
    Call args:  x (n_pad, p);
                per hidden layer l: W_l (in_l, out_l), b_l (1, out_l);
                final layer:        W^T (1, hidden),   b (1, 1).
    Output: (n_pad, 1).
    """
    n_layers = len(layer_dims)

    def kernel(x_ref, *refs):
        out_ref = refs[-1]
        h = x_ref[...]
        # Hidden layers: MXU matmul + bias + LeakyReLU(0.05) on the VPU.
        for l in range(n_layers - 1):
            w = refs[2 * l][...]
            b = refs[2 * l + 1][...]
            if USE_BF16_MATMUL:
                h_mm = h.astype(jnp.bfloat16)
                w = w.astype(jnp.bfloat16)
            else:
                h_mm = h
            h = jnp.dot(h_mm, w, preferred_element_type=jnp.float32) + b
            h = jnp.maximum(h, NEG_SLOPE * h)      # LeakyReLU, slope in (0,1)
        # Final Linear(hidden_dim -> 1): VPU mul + lane-reduce instead of a
        # 1-lane-wide MXU dot (weight arrives pre-transposed as (1, hidden)).
        w_last = refs[2 * (n_layers - 1)][...]     # (1, hidden)
        b_last = refs[2 * (n_layers - 1) + 1][...] # (1, 1)
        y = jnp.sum(h * w_last, axis=-1, keepdims=True) + b_last
        out_ref[...] = y.astype(out_ref.dtype)

    in_specs = [pl.BlockSpec((tile_n, p), lambda i: (i, 0))]       # x: row-tiled
    for l, (din, dout) in enumerate(layer_dims):
        if l < n_layers - 1:
            in_specs.append(pl.BlockSpec((din, dout), lambda i: (0, 0)))  # W resident
            in_specs.append(pl.BlockSpec((1, dout), lambda i: (0, 0)))    # b resident
        else:
            in_specs.append(pl.BlockSpec((1, din), lambda i: (0, 0)))     # W^T resident
            in_specs.append(pl.BlockSpec((1, 1), lambda i: (0, 0)))       # b resident

    out_spec = pl.BlockSpec((tile_n, 1), lambda i: (i, 0))
    # TODO(synk): output stays (n, 1); lane-dense output slab only matters if the
    # kernel ever becomes store-slot-bound (output bytes are negligible here).

    return pl.pallas_call(
        kernel,
        out_shape=jax.ShapeDtypeStruct((n_pad, 1), dtype),
        grid_spec=pltpu.PrefetchScalarGridSpec(
            num_scalar_prefetch=0,
            grid=(n_pad // tile_n,),
            in_specs=in_specs,
            out_specs=out_spec,
        ),
        compiler_params=pltpu.CompilerParams(
            dimension_semantics=("parallel",)),    # megacore sharding on v7x
    )


@functools.lru_cache(maxsize=None)
def _get_forward_fn(n, p, layer_dims, dtype_name):
    """Compiled forward for one (n, p, layer shapes, dtype) signature."""
    dtype = np.dtype(dtype_name)
    tile_n = _choose_tile(n)
    n_pad = _round_up(n, tile_n)
    pallas_fn = _make_pallas_mlp(n_pad, tile_n, p, layer_dims, dtype)

    @jax.jit
    def fwd(x, *params):
        if n_pad != n:
            x = jnp.pad(x, ((0, n_pad - n), (0, 0)))
        out = pallas_fn(x, *params)
        if n_pad != n:
            out = out[:n]
        return out

    return fwd


class MaskedNNPallas:
    """JAX/Pallas re-implementation of castle ... masked_nn.MaskedNN."""

    def __init__(self, mask, hidden_layers, hidden_dim, key):
        self.mask = np.asarray(mask)
        self.hidden_layers = hidden_layers
        self.hidden_dim = hidden_dim
        self.nets = {}        # per-node [(W (in,out), b (1,out)), ...] (reference layout)
        self.params = {}      # per-node flat kernel args (final W pre-transposed)
        self.layer_dims = {}  # per-node tuple of (in, out) per layer
        self._init_nn(key)

    def _linear_params(self, key, in_dim, out_dim):
        # nn.Linear default init: U(-1/sqrt(in), 1/sqrt(in)) for W and b.
        wk, bk = jax.random.split(key)
        bound = 1.0 / math.sqrt(in_dim)
        W = jax.random.uniform(wk, (in_dim, out_dim), jnp.float32, -bound, bound)
        b = jax.random.uniform(bk, (1, out_dim), jnp.float32, -bound, bound)
        return W, b

    def _init_nn(self, key):
        d = self.mask.shape[0]
        for i in range(d):
            pns_parents = np.where(self.mask[:, i] == 1)[0]
            first_input_dim = len([int(j) for j in pns_parents if j != i])
            if first_input_dim == 0:
                continue
            layers = []
            for j in range(self.hidden_layers):
                in_dim = first_input_dim if j == 0 else self.hidden_dim
                key, sub = jax.random.split(key)
                layers.append(self._linear_params(sub, in_dim, self.hidden_dim))
            key, sub = jax.random.split(key)
            layers.append(self._linear_params(sub, self.hidden_dim, 1))
            self.nets[str(i)] = layers

            flat = []
            for l, (w, b) in enumerate(layers):
                if l < len(layers) - 1:
                    flat.extend([w, b])
                else:
                    flat.extend([w.T, b])          # (1, hidden) for the VPU+reduce path
            self.params[str(i)] = tuple(flat)
            self.layer_dims[str(i)] = tuple((w.shape[0], w.shape[1]) for (w, _) in layers)
        # TODO(synk): packing all nodes' MLPs into a single padded (d, in, out) batch
        # kernel would recover MXU lane utilization across nodes, but forward(x, choice)
        # evaluates one node at a time, so the per-node kernel is kept (and cached).

    def forward(self, x, choice):
        choice = str(choice)
        n, p = x.shape
        fwd = _get_forward_fn(n, p, self.layer_dims[choice], np.dtype(x.dtype).name)
        return fwd(x, *self.params[choice])

    # plain-JAX reference (mirrors the PyTorch Sequential) for verification
    def forward_ref(self, x, choice):
        layers = self.nets[str(choice)]
        h = x
        for l, (w, b) in enumerate(layers):
            h = h @ w + b
            if l < len(layers) - 1:
                h = jnp.where(h > 0, h, NEG_SLOPE * h)
        return h


if __name__ == "__main__":
    # 4-node graph; node "1" has candidate parents {0, 2, 3}.
    mask = np.array(
        [
            [0, 1, 0, 0],
            [0, 0, 1, 0],
            [0, 1, 0, 0],
            [0, 1, 1, 0],
        ],
        dtype=np.int32,
    )
    hidden_layers = 2
    hidden_dim = 32
    choice = "1"

    key = jax.random.PRNGKey(0)
    key, pkey, xkey, xkey2 = jax.random.split(key, 4)

    model = MaskedNNPallas(mask, hidden_layers, hidden_dim, pkey)

    pns_parents = np.where(mask[:, int(choice)] == 1)[0]
    first_input_dim = len([int(j) for j in pns_parents if j != int(choice)])

    # Small case (single row tile).
    n_small = 8
    x_small = jax.random.normal(xkey, (n_small, first_input_dim), dtype=jnp.float32)
    out_small = jax.block_until_ready(model.forward(x_small, choice))
    ref_small = model.forward_ref(x_small, choice)
    assert out_small.shape == (n_small, 1), out_small.shape
    assert np.allclose(np.asarray(out_small), np.asarray(ref_small),
                       rtol=1e-4, atol=1e-4)

    # Larger case: multiple row tiles -> pipelined grid (+ 2-TC sharding on v7x).
    n_big = 2048
    x_big = jax.random.normal(xkey2, (n_big, first_input_dim), dtype=jnp.float32)
    out_big = jax.block_until_ready(model.forward(x_big, choice))
    ref_big = model.forward_ref(x_big, choice)
    assert out_big.shape == (n_big, 1), out_big.shape
    assert np.allclose(np.asarray(out_big), np.asarray(ref_big),
                       rtol=1e-4, atol=1e-4)

    # Second call with the same shapes hits the cached compiled executable.
    out_big2 = jax.block_until_ready(model.forward(x_big, choice))
    assert np.allclose(np.asarray(out_big2), np.asarray(out_big))

    print("KERNEL_OK")
</pallas_src>

<mosaic_0001>
module attributes {stable_mosaic.version = 11 : i64} {
  func.func @kernel(%arg0: i32, %arg1: memref<8x3xf32, #tpu.memory_space<vmem>>, %arg2: memref<3x32xf32, #tpu.memory_space<vmem>>, %arg3: memref<1x32xf32, #tpu.memory_space<vmem>>, %arg4: memref<32x32xf32, #tpu.memory_space<vmem>>, %arg5: memref<1x32xf32, #tpu.memory_space<vmem>>, %arg6: memref<1x32xf32, #tpu.memory_space<vmem>>, %arg7: memref<1x1xf32, #tpu.memory_space<vmem>>, %arg8: memref<8x1xf32, #tpu.memory_space<vmem>>) attributes {dimension_semantics = [#tpu.dimension_semantics<parallel>], iteration_bounds = array<i64: 1>, scalar_prefetch = 0 : i64, scratch_operands = 0 : i64, tpu.core_type = #tpu.core_type<tc>, window_params = [{transform_indices = @transform_0, window_bounds = array<i64: 8, 3>}, {pipeline_mode = #tpu.pipeline_mode<synchronous>, transform_indices = @transform_1, window_bounds = array<i64: 3, 32>}, {pipeline_mode = #tpu.pipeline_mode<synchronous>, transform_indices = @transform_2, window_bounds = array<i64: 1, 32>}, {pipeline_mode = #tpu.pipeline_mode<synchronous>, transform_indices = @transform_3, window_bounds = array<i64: 32, 32>}, {pipeline_mode = #tpu.pipeline_mode<synchronous>, transform_indices = @transform_4, window_bounds = array<i64: 1, 32>}, {pipeline_mode = #tpu.pipeline_mode<synchronous>, transform_indices = @transform_5, window_bounds = array<i64: 1, 32>}, {pipeline_mode = #tpu.pipeline_mode<synchronous>, transform_indices = @transform_6, window_bounds = array<i64: 1, 1>}, {transform_indices = @transform_7, window_bounds = array<i64: 8, 1>}]} {
    %c0 = arith.constant 0 : index
    %c0_0 = arith.constant 0 : index
    %0 = vector.load %arg1[%c0, %c0_0] : memref<8x3xf32, #tpu.memory_space<vmem>>, vector<8x3xf32>
    %c0_1 = arith.constant 0 : index
    %c0_2 = arith.constant 0 : index
    %1 = vector.load %arg2[%c0_1, %c0_2] : memref<3x32xf32, #tpu.memory_space<vmem>>, vector<3x32xf32>
    %c0_3 = arith.constant 0 : index
    %c0_4 = arith.constant 0 : index
    %2 = vector.load %arg3[%c0_3, %c0_4] : memref<1x32xf32, #tpu.memory_space<vmem>>, vector<1x32xf32>
    %cst = arith.constant dense<0.000000e+00> : vector<8x32xf32>
    %3 = tpu.matmul %0, %1, %cst {dimension_numbers = #tpu.dot_dimension_numbers<[1], [0], [0], [1], [0, 0, 1, 1], [], []>} : vector<8x3xf32>, vector<3x32xf32>, vector<8x32xf32> -> vector<8x32xf32>
    %4 = vector.broadcast %2 : vector<1x32xf32> to vector<8x32xf32>
    %5 = arith.addf %3, %4 : vector<8x32xf32>
    %cst_5 = arith.constant 5.000000e-02 : f32
    %6 = vector.broadcast %cst_5 : f32 to vector<8x32xf32>
    %7 = arith.mulf %6, %5 : vector<8x32xf32>
    %8 = arith.maximumf %5, %7 : vector<8x32xf32>
    %c0_6 = arith.constant 0 : index
    %c0_7 = arith.constant 0 : index
    %9 = vector.load %arg4[%c0_6, %c0_7] : memref<32x32xf32, #tpu.memory_space<vmem>>, vector<32x32xf32>
    %c0_8 = arith.constant 0 : index
    %c0_9 = arith.constant 0 : index
    %10 = vector.load %arg5[%c0_8, %c0_9] : memref<1x32xf32, #tpu.memory_space<vmem>>, vector<1x32xf32>
    %cst_10 = arith.constant dense<0.000000e+00> : vector<8x32xf32>
    %11 = tpu.matmul %8, %9, %cst_10 {dimension_numbers = #tpu.dot_dimension_numbers<[1], [0], [0], [1], [0, 0, 1, 1], [], []>} : vector<8x32xf32>, vector<32x32xf32>, vector<8x32xf32> -> vector<8x32xf32>
    %12 = vector.broadcast %10 : vector<1x32xf32> to vector<8x32xf32>
    %13 = arith.addf %11, %12 : vector<8x32xf32>
    %cst_11 = arith.constant 5.000000e-02 : f32
    %14 = vector.broadcast %cst_11 : f32 to vector<8x32xf32>
    %15 = arith.mulf %14, %13 : vector<8x32xf32>
    %16 = arith.maximumf %13, %15 : vector<8x32xf32>
    %c0_12 = arith.constant 0 : index
    %c0_13 = arith.constant 0 : index
    %17 = vector.load %arg6[%c0_12, %c0_13] : memref<1x32xf32, #tpu.memory_space<vmem>>, vector<1x32xf32>
    %c0_14 = arith.constant 0 : index
    %c0_15 = arith.constant 0 : index
    %18 = vector.load %arg7[%c0_14, %c0_15] : memref<1x1xf32, #tpu.memory_space<vmem>>, vector<1x1xf32>
    %19 = vector.broadcast %17 : vector<1x32xf32> to vector<8x32xf32>
    %20 = arith.mulf %16, %19 : vector<8x32xf32>
    %cst_16 = arith.constant dense<0.000000e+00> : vector<8xf32>
    %21 = vector.multi_reduction <add>, %20, %cst_16 [1] : vector<8x32xf32> to vector<8xf32>
    %22 = vector.shape_cast %21 : vector<8xf32> to vector<8x1xf32>
    %23 = vector.broadcast %18 : vector<1x1xf32> to vector<8x1xf32>
    %24 = arith.addf %22, %23 : vector<8x1xf32>
    %c0_17 = arith.constant 0 : index
    %c0_18 = arith.constant 0 : index
    %25 = vector.load %arg8[%c0_17, %c0_18] : memref<8x1xf32, #tpu.memory_space<vmem>>, vector<8x1xf32>
    tpu.vector_store %arg8[%c0_17, %c0_18], %24 {strides = array<i32>} : memref<8x1xf32, #tpu.memory_space<vmem>>, vector<8x1xf32>,
    return
  }
  func.func @transform_0(%arg0: i32) -> (i32, i32) {
    %c0_i32 = arith.constant 0 : i32
    %c0_i32_0 = arith.constant 0 : i32
    return %arg0, %c0_i32 : i32, i32
  }
  func.func @transform_1(%arg0: i32) -> (i32, i32) {
    %c0_i32 = arith.constant 0 : i32
    %c0_i32_0 = arith.constant 0 : i32
    %c0_i32_1 = arith.constant 0 : i32
    return %c0_i32, %c0_i32_0 : i32, i32
  }
  func.func @transform_2(%arg0: i32) -> (i32, i32) {
    %c0_i32 = arith.constant 0 : i32
    %c0_i32_0 = arith.constant 0 : i32
    %c0_i32_1 = arith.constant 0 : i32
    return %c0_i32, %c0_i32_0 : i32, i32
  }
  func.func @transform_3(%arg0: i32) -> (i32, i32) {
    %c0_i32 = arith.constant 0 : i32
    %c0_i32_0 = arith.constant 0 : i32
    %c0_i32_1 = arith.constant 0 : i32
    return %c0_i32, %c0_i32_0 : i32, i32
  }
  func.func @transform_4(%arg0: i32) -> (i32, i32) {
    %c0_i32 = arith.constant 0 : i32
    %c0_i32_0 = arith.constant 0 : i32
    %c0_i32_1 = arith.constant 0 : i32
    return %c0_i32, %c0_i32_0 : i32, i32
  }
  func.func @transform_5(%arg0: i32) -> (i32, i32) {
    %c0_i32 = arith.constant 0 : i32
    %c0_i32_0 = arith.constant 0 : i32
    %c0_i32_1 = arith.constant 0 : i32
    return %c0_i32, %c0_i32_0 : i32, i32
  }
  func.func @transform_6(%arg0: i32) -> (i32, i32) {
    %c0_i32 = arith.constant 0 : i32
    %c0_i32_0 = arith.constant 0 : i32
    %c0_i32_1 = arith.constant 0 : i32
    return %c0_i32, %c0_i32_0 : i32, i32
  }
  func.func @transform_7(%arg0: i32) -> (i32, i32) {
    %c0_i32 = arith.constant 0 : i32
    %c0_i32_0 = arith.constant 0 : i32
    return %arg0, %c0_i32 : i32, i32
  }
}

</mosaic_0001>

<bundles_post_ra>
// kernel: fwd.1
= control target key start
LH: loop header
LB: loop body
LE: loop exit
PB: predicated region body
PF: predicated region fallthrough
CT: control target
= control target key end

     0   :  { %s389_s0 = inlined_call_operand.vmem [shape: f32[8,3], index: 0, kind: input, shape index: {}]   ;;  %s390_s1 = inlined_call_operand.vmem [shape: f32[3,32], index: 1, kind: input, shape index: {}]   ;;  %s391_s2 = inlined_call_operand.vmem [shape: f32[1,32], index: 2, kind: input, shape index: {}]   ;;  %s392_s3 = inlined_call_operand.hbm [shape: f32[32,32], index: 3, kind: input, shape index: {}]   ;;  %s393_s4 = inlined_call_operand.vmem [shape: f32[1,32], index: 4, kind: input, shape index: {}]   ;;  %s394_s5 = inlined_call_operand.vmem [shape: f32[1,32], index: 5, kind: input, shape index: {}]   ;;  %s395_s6 = inlined_call_operand.<no memory space> [shape: f32[1,1], index: 6, kind: input, shape index: {}]   ;;  %s396_s7 = inlined_call_operand.vmem [shape: f32[8,1], index: 7, kind: output, shape index: {}]  }
   0x1   :  { %v12_v0 = vstv %s395_s6 }
   0x2   :  { %13 = vst [vmem:[#allocation2] sm:$0x1] %v12_v0 }
   0x3   :  { %14 = vsyncpa [#allocation4], 0  ;;  %s310_s26 = smov [#allocation3]   ;;  %s286_s30 = scalar_lea.hbm %s392_s3, 512 }
   0x4   :  { %s26_s27 = sshll.u32 %s310_s26, 4  ;;  %p287_p0 = scmp.ne.s32.totalorder %s392_s3, %s286_s30  ;;  %s27_s27 = int_to_ptr.vmem [resolvable:$true] %s26_s27 }
   0x5   :  { %p290_p1 = scmp.lt.u32.totalorder %s286_s30, %s392_s3 }
   0x7   :  { %p292_p2 = pnand %p290_p1, %p287_p0 }
   0x9   :  { %295 = shalt.err (!%p292_p2)
}
   0xa   :  { %s296_s6 = scalar_lea.vmem %s27_s27, 512  ;;  %p301_p4 = scmp.lt.s32.totalorder %s27_s27, %s27_s27 }
   0xb   :  { %p297_p3 = scmp.ne.s32.totalorder %s27_s27, %s296_s6  ;;  %p302_p5 = scmp.lt.s32.totalorder %s296_s6, %s296_s6 }
   0xd   :  { %p303_p6 = por %p302_p5, %p301_p4 }
   0xf   :  { %p304_p7 = pnand %p303_p6, %p297_p3 }
  0x11   :  { %307 = shalt.err (!%p304_p7)
}
  0x12   :  { %s311_s12 = smov 128   ;;  %s312_s13 = smov 8  }
  0x13   :  { %32 = dma.hbm_to_vmem [thread:$0]  %s392_s3, 512, %s27_s27, [#allocation4], %s311_s12, %s311_s12, %s312_s13  }
  0x14   :  { %308 = dma.done.wait [#allocation4], 512  }
  0x15   :  { %309 = vsyncadd [#allocation4], 4294966784  ;;  %v313_v1 = vmov 0.0   ;;  %vm314_vm0 = vmmov 0   ;;  %v315_v2 = vmov 0.0|0.0   ;;  %vm55_vm1 = vcmask 1042432  }
  0x16   :  { %258 = vmatprep.subr.mxu0 %v313_v1  ;;  %260 = vmatprep.mubr.msk.f32.mxu0 %vm314_vm0, %v313_v1  ;;  %vm51_vm2 = vcmask 23552   ;;  %v43_v3 = vld [vmem:[%s390_s1] sm:$0x7]  ;;  %v132_v6 = vld [vmem:[#allocation3 + $0x8] sm:$0xff]  ;;  %v133_v8 = vld [vmem:[#allocation3 + $0x10] sm:$0xff]  ;;  %vm142_vm3 = vcmask 261120  }
  0x17   :  { %274 = vmatprep.subr.bf16.mxu1 %v315_v2  ;;  %271 = vmatprep.mubr.msk.f32.mxu1 %vm314_vm0, %v313_v1  ;;  %v42_v4 = vld [vmem:[%s389_s0] sm:$0xff]  ;;  %vm237_vm4 = vcmask 7168  }
  0x18   :  { %259 = vmatpush3.msk.msra.mxu0 %vm55_vm1, %v43_v3  ;;  %v131_v5 = vld [vmem:[#allocation3] sm:$0xff]  ;;  %v134_v9 = vld [vmem:[#allocation3 + $0x18] sm:$0xff] }
  0x19   :  { %261 = vmatmul.mubr.msk.f32.vlgmr.msra.gmra.mrb[0].mxu0 %vm51_vm2, %v42_v4  ;;  %v275_v7 = vpack.c.bf16 %v132_v6, %v131_v5  ;;  %v278_v10 = vpack.c.bf16 %v134_v9, %v133_v8  ;;  %v244_v11 = vld [vmem:[%s391_s2] ss:$0 sm:$0xff] }
  0x1a   :  { %v247_v17 = vld [vmem:[%s393_s4] ss:$0 sm:$0xff] }
  0x1b   :  { %276 = vmatpush3.bf16.msra.mxu1 %v275_v7  ;;  %v249_v22 = vld [vmem:[%s394_s5] ss:$0 sm:$0xff] }
  0x1c   :  { %277 = vmatprep.subr.bf16.mxu1 %v315_v2  ;;  %v250_v26 = vld [vmem:[#allocation2] ss:$0 sm:$0xff] }
  0x1f   :  { %279 = vmatpush3.bf16.msra.mxu1 %v278_v10 }
  0xec   :  { %v125_v12 = vpop.f32.mrb[0].mxu0 }
  0xed   :  { %v126_v13 = vadd.f32 %v244_v11, %v125_v12  ;;  %v262_v14 = vpop.f32.mrb[1].mxu0 }
  0xef   :  { %v129_v15 = vmul.f32 0.05, %v126_v13 }
  0xf1   :  { %v130_v16 = vmax.f32 %v126_v13, %v129_v15 }
  0xf3   :  { %272 = vmatmul.mubr.msk.f32.vlgmr.msra.gmra.mrb[0].mxu1 %vm142_vm3, %v130_v16 }
 0x1c6   :  { %v212_v18 = vpop.f32.mrb[0].mxu1 }
 0x1c7   :  { %v213_v19 = vadd.f32 %v247_v17, %v212_v18  ;;  %v273_v20 = vpop.f32.mrb[1].mxu1 }
 0x1c9   :  { %v216_v21 = vmul.f32 0.05, %v213_v19 }
 0x1cb   :  { %v217_v23 = vmax.f32 %v213_v19, %v216_v21 }
 0x1cd   :  { %v226_v24 = vmul.f32 %v249_v22, %v217_v23 }
 0x1cf   :  { %v227_v25 = vsel %vm142_vm3, %v226_v24, 0.0 }
 0x1d0   :  { %228 = vadd.xlane.f32.xlu0 %v227_v25 }
 0x25d   :  { %v229_v27 = vpop.xlane.xlu0 %228 }
 0x25e   :  { %v236_v28 = vadd.f32 %v250_v26, %v229_v27 }
 0x260   :  { %238 = vst.msk [vmem:[%s396_s7] sm:$0xff] %vm237_vm4, %v236_v28 }
 0x261   :  { %243 = vsyncpa [#allocation4], 1 }

</bundles_post_ra>
